<compile_context>
chip_gen: v6e
topology: v6e:2x2x1
jax: 0.10.0
libtpu: 0.0.40
codegen_flags: <defaults>
</compile_context>

<pallas_src>
import jax
import jax.numpy as jnp
from jax.experimental import pallas as pl
from jax.experimental.pallas import tpu as pltpu

INPUT_SIZE = 22   # nn.LSTM(22, ...)
HIDDEN = 10       # nn.LSTM(..., 10, 1, batch_first=True)
OUT_FEATURES = 4  # nn.LazyLinear(4)


def lstm_fc_kernel(x_ref,       # (T*B, C)   time-major rows: t*B + b
                   w_ih_ref,    # (C, 4*Hd)  gates fused, PyTorch order i,f,g,o
                   w_hh_ref,    # (Hd, 4*Hd)
                   b_ref,       # (1, 4*Hd)  b_ih + b_hh
                   wfc_ref,     # (T*Hd, 4)  Flatten-ordered FC weight
                   bfc_ref,     # (1, 4)
                   out_ref):    # (B, 4)
    B = out_ref.shape[0]
    T = x_ref.shape[0] // B
    Hd = w_hh_ref.shape[0]

    # Hoist all weight / bias loads out of the time loop.
    w_hh = w_hh_ref[...]
    b = b_ref[...]

    # Input projection for every timestep in one MXU pass; bias folded in once.
    x_proj = jnp.dot(x_ref[...], w_ih_ref[...],
                     preferred_element_type=jnp.float32) + b     # (T*B, 4*Hd)

    # Recurrence: state carried in vregs, one fused gate matmul per step.
    h = jnp.zeros((B, Hd), jnp.float32)
    c = jnp.zeros((B, Hd), jnp.float32)
    hs = []
    for t in range(T):  # tiny static trip count -> fully unrolled
        gates = x_proj[t * B:(t + 1) * B, :] + jnp.dot(
            h, w_hh, preferred_element_type=jnp.float32)          # (B, 4*Hd)
        i_g = jax.nn.sigmoid(gates[:, 0 * Hd:1 * Hd])
        f_g = jax.nn.sigmoid(gates[:, 1 * Hd:2 * Hd])
        g_g = jnp.tanh(gates[:, 2 * Hd:3 * Hd])
        o_g = jax.nn.sigmoid(gates[:, 3 * Hd:4 * Hd])
        c = f_g * c + i_g * g_g
        h = o_g * jnp.tanh(c)
        hs.append(h)

    # Flatten(B, T, Hd) ordering == concat of per-step h along the lane axis.
    h_all = jnp.concatenate(hs, axis=-1)                          # (B, T*Hd)
    out_ref[...] = jnp.dot(h_all, wfc_ref[...],
                           preferred_element_type=jnp.float32) + bfc_ref[...]


def gru_model_forward(x, params):
    """Pallas implementation of GRU_Model.forward (LSTM + Flatten + Linear)."""
    B, C, H, W = x.shape
    assert H == 1 and C == INPUT_SIZE, "x must be (B, 22, 1, W)"
    T = W

    w_ih, w_hh, b_ih, b_hh, w_fc, b_fc = params

    # x.view(B, C, W).permute(0, 2, 1) -> (B, T, C); kernel wants time-major
    # rows, so a single transpose to (T, B, C) then flatten to (T*B, C).
    x_tm = x.reshape(B, C, W).transpose(2, 0, 1).reshape(T * B, C)

    # Fuse the 4 gates into single matrices; pre-transpose for right-multiply.
    w_ih_f = w_ih.T                                   # (C, 4*Hd)
    w_hh_f = w_hh.T                                   # (Hd, 4*Hd)
    b = (b_ih + b_hh).reshape(1, 4 * HIDDEN)          # (1, 4*Hd)

    # (4, T*Hd) -> (T*Hd, 4): row index t*Hd + h matches nn.Flatten ordering.
    wfc_t = w_fc.T
    bfc = b_fc.reshape(1, OUT_FEATURES)

    vmem = pl.BlockSpec(memory_space=pltpu.MemorySpace.VMEM)

    return pl.pallas_call(
        lstm_fc_kernel,
        out_shape=jax.ShapeDtypeStruct((B, OUT_FEATURES), jnp.float32),
        in_specs=[vmem] * 6,
        out_specs=vmem,
    )(x_tm, w_ih_f, w_hh_f, b, wfc_t, bfc)


def reference_forward(x, params):
    """Pure-JAX reference matching PyTorch LSTM + Flatten + Linear semantics."""
    B, C, H, W = x.shape
    w_ih, w_hh, b_ih, b_hh, w_fc, b_fc = params
    x_seq = x.reshape(B, C, W).transpose(0, 2, 1)  # (B, T, C)
    h = jnp.zeros((B, HIDDEN), jnp.float32)
    c = jnp.zeros((B, HIDDEN), jnp.float32)
    outs = []
    for t in range(W):
        xt = x_seq[:, t, :]
        gates = xt @ w_ih.T + b_ih + h @ w_hh.T + b_hh
        i = jax.nn.sigmoid(gates[:, 0 * HIDDEN:1 * HIDDEN])
        f = jax.nn.sigmoid(gates[:, 1 * HIDDEN:2 * HIDDEN])
        g = jnp.tanh(gates[:, 2 * HIDDEN:3 * HIDDEN])
        o = jax.nn.sigmoid(gates[:, 3 * HIDDEN:4 * HIDDEN])
        c = f * c + i * g
        h = o * jnp.tanh(c)
        outs.append(h)
    rnn = jnp.stack(outs, axis=1)                 # (B, T, Hd)
    flat = rnn.reshape(B, W * HIDDEN)             # nn.Flatten
    return flat @ w_fc.T + b_fc                   # nn.LazyLinear(4)


def init_params(key, seq_len):
    """Deterministic PyTorch-style uniform init for LSTM(22,10,1) + Linear(T*10, 4)."""
    ks = jax.random.split(key, 6)
    k_lstm = 1.0 / jnp.sqrt(HIDDEN)
    w_ih = jax.random.uniform(ks[0], (4 * HIDDEN, INPUT_SIZE), jnp.float32,
                              -k_lstm, k_lstm)
    w_hh = jax.random.uniform(ks[1], (4 * HIDDEN, HIDDEN), jnp.float32,
                              -k_lstm, k_lstm)
    b_ih = jax.random.uniform(ks[2], (4 * HIDDEN,), jnp.float32, -k_lstm, k_lstm)
    b_hh = jax.random.uniform(ks[3], (4 * HIDDEN,), jnp.float32, -k_lstm, k_lstm)
    fc_in = seq_len * HIDDEN
    k_fc = 1.0 / jnp.sqrt(fc_in)
    w_fc = jax.random.uniform(ks[4], (OUT_FEATURES, fc_in), jnp.float32,
                              -k_fc, k_fc)
    b_fc = jax.random.uniform(ks[5], (OUT_FEATURES,), jnp.float32, -k_fc, k_fc)
    return (w_ih, w_hh, b_ih, b_hh, w_fc, b_fc)


if __name__ == "__main__":
    key = jax.random.PRNGKey(0)
    k_x, k_p = jax.random.split(key)

    B, C, H, W = 2, INPUT_SIZE, 1, 8           # x.view(B, C, W) requires H == 1
    x = jax.random.normal(k_x, (B, C, H, W), jnp.float32)
    params = init_params(k_p, seq_len=W)

    out = jax.block_until_ready(gru_model_forward(x, params))
    ref = jax.block_until_ready(reference_forward(x, params))

    assert out.shape == (B, OUT_FEATURES)
    assert jnp.allclose(out, ref, atol=1e-5, rtol=1e-5), (out, ref)
    print("KERNEL_OK")
</pallas_src>

<mosaic_0001>
module attributes {stable_mosaic.version = 11 : i64} {
  func.func @lstm_fc_kernel(%arg0: memref<16x22xf32, #tpu.memory_space<vmem>>, %arg1: memref<22x40xf32, #tpu.memory_space<vmem>>, %arg2: memref<10x40xf32, #tpu.memory_space<vmem>>, %arg3: memref<1x40xf32, #tpu.memory_space<vmem>>, %arg4: memref<80x4xf32, #tpu.memory_space<vmem>>, %arg5: memref<1x4xf32, #tpu.memory_space<vmem>>, %arg6: memref<2x4xf32, #tpu.memory_space<vmem>>) attributes {dimension_semantics = [], scalar_prefetch = 0 : i64, scratch_operands = 0 : i64, tpu.core_type = #tpu.core_type<tc>} {
    %c0 = arith.constant 0 : index
    %c0_0 = arith.constant 0 : index
    %0 = vector.load %arg2[%c0, %c0_0] : memref<10x40xf32, #tpu.memory_space<vmem>>, vector<10x40xf32>
    %c0_1 = arith.constant 0 : index
    %c0_2 = arith.constant 0 : index
    %1 = vector.load %arg3[%c0_1, %c0_2] : memref<1x40xf32, #tpu.memory_space<vmem>>, vector<1x40xf32>
    %c0_3 = arith.constant 0 : index
    %c0_4 = arith.constant 0 : index
    %2 = vector.load %arg0[%c0_3, %c0_4] : memref<16x22xf32, #tpu.memory_space<vmem>>, vector<16x22xf32>
    %c0_5 = arith.constant 0 : index
    %c0_6 = arith.constant 0 : index
    %3 = vector.load %arg1[%c0_5, %c0_6] : memref<22x40xf32, #tpu.memory_space<vmem>>, vector<22x40xf32>
    %cst = arith.constant dense<0.000000e+00> : vector<16x40xf32>
    %4 = tpu.matmul %2, %3, %cst {dimension_numbers = #tpu.dot_dimension_numbers<[1], [0], [0], [1], [0, 0, 1, 1], [], []>} : vector<16x22xf32>, vector<22x40xf32>, vector<16x40xf32> -> vector<16x40xf32>
    %5 = vector.broadcast %1 : vector<1x40xf32> to vector<16x40xf32>
    %6 = arith.addf %4, %5 : vector<16x40xf32>
    %cst_7 = arith.constant 0.000000e+00 : f32
    %7 = vector.broadcast %cst_7 : f32 to vector<2x10xf32>
    %cst_8 = arith.constant 0.000000e+00 : f32
    %8 = vector.broadcast %cst_8 : f32 to vector<2x10xf32>
    %9 = vector.extract_strided_slice %6 {offsets = [0, 0], sizes = [2, 40], strides = [1, 1]} : vector<16x40xf32> to vector<2x40xf32>
    %cst_9 = arith.constant dense<0.000000e+00> : vector<2x40xf32>
    %10 = tpu.matmul %7, %0, %cst_9 {dimension_numbers = #tpu.dot_dimension_numbers<[1], [0], [0], [1], [0, 0, 1, 1], [], []>} : vector<2x10xf32>, vector<10x40xf32>, vector<2x40xf32> -> vector<2x40xf32>
    %11 = arith.addf %9, %10 : vector<2x40xf32>
    %12 = vector.extract_strided_slice %11 {offsets = [0, 0], sizes = [2, 10], strides = [1, 1]} : vector<2x40xf32> to vector<2x10xf32>
    %13 = arith.negf %12 : vector<2x10xf32>
    %14 = math.exp %13 : vector<2x10xf32>
    %cst_10 = arith.constant 1.000000e+00 : f32
    %15 = vector.broadcast %cst_10 : f32 to vector<2x10xf32>
    %16 = arith.addf %15, %14 : vector<2x10xf32>
    %17 = arith.divf %15, %16 : vector<2x10xf32>
    %18 = vector.extract_strided_slice %11 {offsets = [0, 10], sizes = [2, 10], strides = [1, 1]} : vector<2x40xf32> to vector<2x10xf32>
    %19 = arith.negf %18 : vector<2x10xf32>
    %20 = math.exp %19 : vector<2x10xf32>
    %cst_11 = arith.constant 1.000000e+00 : f32
    %21 = vector.broadcast %cst_11 : f32 to vector<2x10xf32>
    %22 = arith.addf %21, %20 : vector<2x10xf32>
    %23 = arith.divf %21, %22 : vector<2x10xf32>
    %24 = vector.extract_strided_slice %11 {offsets = [0, 20], sizes = [2, 10], strides = [1, 1]} : vector<2x40xf32> to vector<2x10xf32>
    %25 = math.tanh %24 : vector<2x10xf32>
    %26 = vector.extract_strided_slice %11 {offsets = [0, 30], sizes = [2, 10], strides = [1, 1]} : vector<2x40xf32> to vector<2x10xf32>
    %27 = arith.negf %26 : vector<2x10xf32>
    %28 = math.exp %27 : vector<2x10xf32>
    %cst_12 = arith.constant 1.000000e+00 : f32
    %29 = vector.broadcast %cst_12 : f32 to vector<2x10xf32>
    %30 = arith.addf %29, %28 : vector<2x10xf32>
    %31 = arith.divf %29, %30 : vector<2x10xf32>
    %32 = arith.mulf %23, %8 : vector<2x10xf32>
    %33 = arith.mulf %17, %25 : vector<2x10xf32>
    %34 = arith.addf %32, %33 : vector<2x10xf32>
    %35 = math.tanh %34 : vector<2x10xf32>
    %36 = arith.mulf %31, %35 : vector<2x10xf32>
    %37 = vector.extract_strided_slice %6 {offsets = [2, 0], sizes = [2, 40], strides = [1, 1]} : vector<16x40xf32> to vector<2x40xf32>
    %cst_13 = arith.constant dense<0.000000e+00> : vector<2x40xf32>
    %38 = tpu.matmul %36, %0, %cst_13 {dimension_numbers = #tpu.dot_dimension_numbers<[1], [0], [0], [1], [0, 0, 1, 1], [], []>} : vector<2x10xf32>, vector<10x40xf32>, vector<2x40xf32> -> vector<2x40xf32>
    %39 = arith.addf %37, %38 : vector<2x40xf32>
    %40 = vector.extract_strided_slice %39 {offsets = [0, 0], sizes = [2, 10], strides = [1, 1]} : vector<2x40xf32> to vector<2x10xf32>
    %41 = arith.negf %40 : vector<2x10xf32>
    %42 = math.exp %41 : vector<2x10xf32>
    %cst_14 = arith.constant 1.000000e+00 : f32
    %43 = vector.broadcast %cst_14 : f32 to vector<2x10xf32>
    %44 = arith.addf %43, %42 : vector<2x10xf32>
    %45 = arith.divf %43, %44 : vector<2x10xf32>
    %46 = vector.extract_strided_slice %39 {offsets = [0, 10], sizes = [2, 10], strides = [1, 1]} : vector<2x40xf32> to vector<2x10xf32>
    %47 = arith.negf %46 : vector<2x10xf32>
    %48 = math.exp %47 : vector<2x10xf32>
    %cst_15 = arith.constant 1.000000e+00 : f32
    %49 = vector.broadcast %cst_15 : f32 to vector<2x10xf32>
    %50 = arith.addf %49, %48 : vector<2x10xf32>
    %51 = arith.divf %49, %50 : vector<2x10xf32>
    %52 = vector.extract_strided_slice %39 {offsets = [0, 20], sizes = [2, 10], strides = [1, 1]} : vector<2x40xf32> to vector<2x10xf32>
    %53 = math.tanh %52 : vector<2x10xf32>
    %54 = vector.extract_strided_slice %39 {offsets = [0, 30], sizes = [2, 10], strides = [1, 1]} : vector<2x40xf32> to vector<2x10xf32>
    %55 = arith.negf %54 : vector<2x10xf32>
    %56 = math.exp %55 : vector<2x10xf32>
    %cst_16 = arith.constant 1.000000e+00 : f32
    %57 = vector.broadcast %cst_16 : f32 to vector<2x10xf32>
    %58 = arith.addf %57, %56 : vector<2x10xf32>
    %59 = arith.divf %57, %58 : vector<2x10xf32>
    %60 = arith.mulf %51, %34 : vector<2x10xf32>
    %61 = arith.mulf %45, %53 : vector<2x10xf32>
    %62 = arith.addf %60, %61 : vector<2x10xf32>
    %63 = math.tanh %62 : vector<2x10xf32>
    %64 = arith.mulf %59, %63 : vector<2x10xf32>
    %65 = vector.extract_strided_slice %6 {offsets = [4, 0], sizes = [2, 40], strides = [1, 1]} : vector<16x40xf32> to vector<2x40xf32>
    %cst_17 = arith.constant dense<0.000000e+00> : vector<2x40xf32>
    %66 = tpu.matmul %64, %0, %cst_17 {dimension_numbers = #tpu.dot_dimension_numbers<[1], [0], [0], [1], [0, 0, 1, 1], [], []>} : vector<2x10xf32>, vector<10x40xf32>, vector<2x40xf32> -> vector<2x40xf32>
    %67 = arith.addf %65, %66 : vector<2x40xf32>
    %68 = vector.extract_strided_slice %67 {offsets = [0, 0], sizes = [2, 10], strides = [1, 1]} : vector<2x40xf32> to vector<2x10xf32>
    %69 = arith.negf %68 : vector<2x10xf32>
    %70 = math.exp %69 : vector<2x10xf32>
    %cst_18 = arith.constant 1.000000e+00 : f32
    %71 = vector.broadcast %cst_18 : f32 to vector<2x10xf32>
    %72 = arith.addf %71, %70 : vector<2x10xf32>
    %73 = arith.divf %71, %72 : vector<2x10xf32>
    %74 = vector.extract_strided_slice %67 {offsets = [0, 10], sizes = [2, 10], strides = [1, 1]} : vector<2x40xf32> to vector<2x10xf32>
    %75 = arith.negf %74 : vector<2x10xf32>
    %76 = math.exp %75 : vector<2x10xf32>
    %cst_19 = arith.constant 1.000000e+00 : f32
    %77 = vector.broadcast %cst_19 : f32 to vector<2x10xf32>
    %78 = arith.addf %77, %76 : vector<2x10xf32>
    %79 = arith.divf %77, %78 : vector<2x10xf32>
    %80 = vector.extract_strided_slice %67 {offsets = [0, 20], sizes = [2, 10], strides = [1, 1]} : vector<2x40xf32> to vector<2x10xf32>
    %81 = math.tanh %80 : vector<2x10xf32>
    %82 = vector.extract_strided_slice %67 {offsets = [0, 30], sizes = [2, 10], strides = [1, 1]} : vector<2x40xf32> to vector<2x10xf32>
    %83 = arith.negf %82 : vector<2x10xf32>
    %84 = math.exp %83 : vector<2x10xf32>
    %cst_20 = arith.constant 1.000000e+00 : f32
    %85 = vector.broadcast %cst_20 : f32 to vector<2x10xf32>
    %86 = arith.addf %85, %84 : vector<2x10xf32>
    %87 = arith.divf %85, %86 : vector<2x10xf32>
    %88 = arith.mulf %79, %62 : vector<2x10xf32>
    %89 = arith.mulf %73, %81 : vector<2x10xf32>
    %90 = arith.addf %88, %89 : vector<2x10xf32>
    %91 = math.tanh %90 : vector<2x10xf32>
    %92 = arith.mulf %87, %91 : vector<2x10xf32>
    %93 = vector.extract_strided_slice %6 {offsets = [6, 0], sizes = [2, 40], strides = [1, 1]} : vector<16x40xf32> to vector<2x40xf32>
    %cst_21 = arith.constant dense<0.000000e+00> : vector<2x40xf32>
    %94 = tpu.matmul %92, %0, %cst_21 {dimension_numbers = #tpu.dot_dimension_numbers<[1], [0], [0], [1], [0, 0, 1, 1], [], []>} : vector<2x10xf32>, vector<10x40xf32>, vector<2x40xf32> -> vector<2x40xf32>
    %95 = arith.addf %93, %94 : vector<2x40xf32>
    %96 = vector.extract_strided_slice %95 {offsets = [0, 0], sizes = [2, 10], strides = [1, 1]} : vector<2x40xf32> to vector<2x10xf32>
    %97 = arith.negf %96 : vector<2x10xf32>
    %98 = math.exp %97 : vector<2x10xf32>
    %cst_22 = arith.constant 1.000000e+00 : f32
    %99 = vector.broadcast %cst_22 : f32 to vector<2x10xf32>
    %100 = arith.addf %99, %98 : vector<2x10xf32>
    %101 = arith.divf %99, %100 : vector<2x10xf32>
    %102 = vector.extract_strided_slice %95 {offsets = [0, 10], sizes = [2, 10], strides = [1, 1]} : vector<2x40xf32> to vector<2x10xf32>
    %103 = arith.negf %102 : vector<2x10xf32>
    %104 = math.exp %103 : vector<2x10xf32>
    %cst_23 = arith.constant 1.000000e+00 : f32
    %105 = vector.broadcast %cst_23 : f32 to vector<2x10xf32>
    %106 = arith.addf %105, %104 : vector<2x10xf32>
    %107 = arith.divf %105, %106 : vector<2x10xf32>
    %108 = vector.extract_strided_slice %95 {offsets = [0, 20], sizes = [2, 10], strides = [1, 1]} : vector<2x40xf32> to vector<2x10xf32>
    %109 = math.tanh %108 : vector<2x10xf32>
    %110 = vector.extract_strided_slice %95 {offsets = [0, 30], sizes = [2, 10], strides = [1, 1]} : vector<2x40xf32> to vector<2x10xf32>
    %111 = arith.negf %110 : vector<2x10xf32>
    %112 = math.exp %111 : vector<2x10xf32>
    %cst_24 = arith.constant 1.000000e+00 : f32
    %113 = vector.broadcast %cst_24 : f32 to vector<2x10xf32>
    %114 = arith.addf %113, %112 : vector<2x10xf32>
    %115 = arith.divf %113, %114 : vector<2x10xf32>
    %116 = arith.mulf %107, %90 : vector<2x10xf32>
    %117 = arith.mulf %101, %109 : vector<2x10xf32>
    %118 = arith.addf %116, %117 : vector<2x10xf32>
    %119 = math.tanh %118 : vector<2x10xf32>
    %120 = arith.mulf %115, %119 : vector<2x10xf32>
    %121 = vector.extract_strided_slice %6 {offsets = [8, 0], sizes = [2, 40], strides = [1, 1]} : vector<16x40xf32> to vector<2x40xf32>
    %cst_25 = arith.constant dense<0.000000e+00> : vector<2x40xf32>
    %122 = tpu.matmul %120, %0, %cst_25 {dimension_numbers = #tpu.dot_dimension_numbers<[1], [0], [0], [1], [0, 0, 1, 1], [], []>} : vector<2x10xf32>, vector<10x40xf32>, vector<2x40xf32> -> vector<2x40xf32>
    %123 = arith.addf %121, %122 : vector<2x40xf32>
    %124 = vector.extract_strided_slice %123 {offsets = [0, 0], sizes = [2, 10], strides = [1, 1]} : vector<2x40xf32> to vector<2x10xf32>
    %125 = arith.negf %124 : vector<2x10xf32>
    %126 = math.exp %125 : vector<2x10xf32>
    %cst_26 = arith.constant 1.000000e+00 : f32
    %127 = vector.broadcast %cst_26 : f32 to vector<2x10xf32>
    %128 = arith.addf %127, %126 : vector<2x10xf32>
    %129 = arith.divf %127, %128 : vector<2x10xf32>
    %130 = vector.extract_strided_slice %123 {offsets = [0, 10], sizes = [2, 10], strides = [1, 1]} : vector<2x40xf32> to vector<2x10xf32>
    %131 = arith.negf %130 : vector<2x10xf32>
    %132 = math.exp %131 : vector<2x10xf32>
    %cst_27 = arith.constant 1.000000e+00 : f32
    %133 = vector.broadcast %cst_27 : f32 to vector<2x10xf32>
    %134 = arith.addf %133, %132 : vector<2x10xf32>
    %135 = arith.divf %133, %134 : vector<2x10xf32>
    %136 = vector.extract_strided_slice %123 {offsets = [0, 20], sizes = [2, 10], strides = [1, 1]} : vector<2x40xf32> to vector<2x10xf32>
    %137 = math.tanh %136 : vector<2x10xf32>
    %138 = vector.extract_strided_slice %123 {offsets = [0, 30], sizes = [2, 10], strides = [1, 1]} : vector<2x40xf32> to vector<2x10xf32>
    %139 = arith.negf %138 : vector<2x10xf32>
    %140 = math.exp %139 : vector<2x10xf32>
    %cst_28 = arith.constant 1.000000e+00 : f32
    %141 = vector.broadcast %cst_28 : f32 to vector<2x10xf32>
    %142 = arith.addf %141, %140 : vector<2x10xf32>
    %143 = arith.divf %141, %142 : vector<2x10xf32>
    %144 = arith.mulf %135, %118 : vector<2x10xf32>
    %145 = arith.mulf %129, %137 : vector<2x10xf32>
    %146 = arith.addf %144, %145 : vector<2x10xf32>
    %147 = math.tanh %146 : vector<2x10xf32>
    %148 = arith.mulf %143, %147 : vector<2x10xf32>
    %149 = vector.extract_strided_slice %6 {offsets = [10, 0], sizes = [2, 40], strides = [1, 1]} : vector<16x40xf32> to vector<2x40xf32>
    %cst_29 = arith.constant dense<0.000000e+00> : vector<2x40xf32>
    %150 = tpu.matmul %148, %0, %cst_29 {dimension_numbers = #tpu.dot_dimension_numbers<[1], [0], [0], [1], [0, 0, 1, 1], [], []>} : vector<2x10xf32>, vector<10x40xf32>, vector<2x40xf32> -> vector<2x40xf32>
    %151 = arith.addf %149, %150 : vector<2x40xf32>
    %152 = vector.extract_strided_slice %151 {offsets = [0, 0], sizes = [2, 10], strides = [1, 1]} : vector<2x40xf32> to vector<2x10xf32>
    %153 = arith.negf %152 : vector<2x10xf32>
    %154 = math.exp %153 : vector<2x10xf32>
    %cst_30 = arith.constant 1.000000e+00 : f32
    %155 = vector.broadcast %cst_30 : f32 to vector<2x10xf32>
    %156 = arith.addf %155, %154 : vector<2x10xf32>
    %157 = arith.divf %155, %156 : vector<2x10xf32>
    %158 = vector.extract_strided_slice %151 {offsets = [0, 10], sizes = [2, 10], strides = [1, 1]} : vector<2x40xf32> to vector<2x10xf32>
    %159 = arith.negf %158 : vector<2x10xf32>
    %160 = math.exp %159 : vector<2x10xf32>
    %cst_31 = arith.constant 1.000000e+00 : f32
    %161 = vector.broadcast %cst_31 : f32 to vector<2x10xf32>
    %162 = arith.addf %161, %160 : vector<2x10xf32>
    %163 = arith.divf %161, %162 : vector<2x10xf32>
    %164 = vector.extract_strided_slice %151 {offsets = [0, 20], sizes = [2, 10], strides = [1, 1]} : vector<2x40xf32> to vector<2x10xf32>
    %165 = math.tanh %164 : vector<2x10xf32>
    %166 = vector.extract_strided_slice %151 {offsets = [0, 30], sizes = [2, 10], strides = [1, 1]} : vector<2x40xf32> to vector<2x10xf32>
    %167 = arith.negf %166 : vector<2x10xf32>
    %168 = math.exp %167 : vector<2x10xf32>
    %cst_32 = arith.constant 1.000000e+00 : f32
    %169 = vector.broadcast %cst_32 : f32 to vector<2x10xf32>
    %170 = arith.addf %169, %168 : vector<2x10xf32>
    %171 = arith.divf %169, %170 : vector<2x10xf32>
    %172 = arith.mulf %163, %146 : vector<2x10xf32>
    %173 = arith.mulf %157, %165 : vector<2x10xf32>
    %174 = arith.addf %172, %173 : vector<2x10xf32>
    %175 = math.tanh %174 : vector<2x10xf32>
    %176 = arith.mulf %171, %175 : vector<2x10xf32>
    %177 = vector.extract_strided_slice %6 {offsets = [12, 0], sizes = [2, 40], strides = [1, 1]} : vector<16x40xf32> to vector<2x40xf32>
    %cst_33 = arith.constant dense<0.000000e+00> : vector<2x40xf32>
    %178 = tpu.matmul %176, %0, %cst_33 {dimension_numbers = #tpu.dot_dimension_numbers<[1], [0], [0], [1], [0, 0, 1, 1], [], []>} : vector<2x10xf32>, vector<10x40xf32>, vector<2x40xf32> -> vector<2x40xf32>
    %179 = arith.addf %177, %178 : vector<2x40xf32>
    %180 = vector.extract_strided_slice %179 {offsets = [0, 0], sizes = [2, 10], strides = [1, 1]} : vector<2x40xf32> to vector<2x10xf32>
    %181 = arith.negf %180 : vector<2x10xf32>
    %182 = math.exp %181 : vector<2x10xf32>
    %cst_34 = arith.constant 1.000000e+00 : f32
    %183 = vector.broadcast %cst_34 : f32 to vector<2x10xf32>
    %184 = arith.addf %183, %182 : vector<2x10xf32>
    %185 = arith.divf %183, %184 : vector<2x10xf32>
    %186 = vector.extract_strided_slice %179 {offsets = [0, 10], sizes = [2, 10], strides = [1, 1]} : vector<2x40xf32> to vector<2x10xf32>
    %187 = arith.negf %186 : vector<2x10xf32>
    %188 = math.exp %187 : vector<2x10xf32>
    %cst_35 = arith.constant 1.000000e+00 : f32
    %189 = vector.broadcast %cst_35 : f32 to vector<2x10xf32>
    %190 = arith.addf %189, %188 : vector<2x10xf32>
    %191 = arith.divf %189, %190 : vector<2x10xf32>
    %192 = vector.extract_strided_slice %179 {offsets = [0, 20], sizes = [2, 10], strides = [1, 1]} : vector<2x40xf32> to vector<2x10xf32>
    %193 = math.tanh %192 : vector<2x10xf32>
    %194 = vector.extract_strided_slice %179 {offsets = [0, 30], sizes = [2, 10], strides = [1, 1]} : vector<2x40xf32> to vector<2x10xf32>
    %195 = arith.negf %194 : vector<2x10xf32>
    %196 = math.exp %195 : vector<2x10xf32>
    %cst_36 = arith.constant 1.000000e+00 : f32
    %197 = vector.broadcast %cst_36 : f32 to vector<2x10xf32>
    %198 = arith.addf %197, %196 : vector<2x10xf32>
    %199 = arith.divf %197, %198 : vector<2x10xf32>
    %200 = arith.mulf %191, %174 : vector<2x10xf32>
    %201 = arith.mulf %185, %193 : vector<2x10xf32>
    %202 = arith.addf %200, %201 : vector<2x10xf32>
    %203 = math.tanh %202 : vector<2x10xf32>
    %204 = arith.mulf %199, %203 : vector<2x10xf32>
    %205 = vector.extract_strided_slice %6 {offsets = [14, 0], sizes = [2, 40], strides = [1, 1]} : vector<16x40xf32> to vector<2x40xf32>
    %cst_37 = arith.constant dense<0.000000e+00> : vector<2x40xf32>
    %206 = tpu.matmul %204, %0, %cst_37 {dimension_numbers = #tpu.dot_dimension_numbers<[1], [0], [0], [1], [0, 0, 1, 1], [], []>} : vector<2x10xf32>, vector<10x40xf32>, vector<2x40xf32> -> vector<2x40xf32>
    %207 = arith.addf %205, %206 : vector<2x40xf32>
    %208 = vector.extract_strided_slice %207 {offsets = [0, 0], sizes = [2, 10], strides = [1, 1]} : vector<2x40xf32> to vector<2x10xf32>
    %209 = arith.negf %208 : vector<2x10xf32>
    %210 = math.exp %209 : vector<2x10xf32>
    %cst_38 = arith.constant 1.000000e+00 : f32
    %211 = vector.broadcast %cst_38 : f32 to vector<2x10xf32>
    %212 = arith.addf %211, %210 : vector<2x10xf32>
    %213 = arith.divf %211, %212 : vector<2x10xf32>
    %214 = vector.extract_strided_slice %207 {offsets = [0, 10], sizes = [2, 10], strides = [1, 1]} : vector<2x40xf32> to vector<2x10xf32>
    %215 = arith.negf %214 : vector<2x10xf32>
    %216 = math.exp %215 : vector<2x10xf32>
    %cst_39 = arith.constant 1.000000e+00 : f32
    %217 = vector.broadcast %cst_39 : f32 to vector<2x10xf32>
    %218 = arith.addf %217, %216 : vector<2x10xf32>
    %219 = arith.divf %217, %218 : vector<2x10xf32>
    %220 = vector.extract_strided_slice %207 {offsets = [0, 20], sizes = [2, 10], strides = [1, 1]} : vector<2x40xf32> to vector<2x10xf32>
    %221 = math.tanh %220 : vector<2x10xf32>
    %222 = vector.extract_strided_slice %207 {offsets = [0, 30], sizes = [2, 10], strides = [1, 1]} : vector<2x40xf32> to vector<2x10xf32>
    %223 = arith.negf %222 : vector<2x10xf32>
    %224 = math.exp %223 : vector<2x10xf32>
    %cst_40 = arith.constant 1.000000e+00 : f32
    %225 = vector.broadcast %cst_40 : f32 to vector<2x10xf32>
    %226 = arith.addf %225, %224 : vector<2x10xf32>
    %227 = arith.divf %225, %226 : vector<2x10xf32>
    %228 = arith.mulf %219, %202 : vector<2x10xf32>
    %229 = arith.mulf %213, %221 : vector<2x10xf32>
    %230 = arith.addf %228, %229 : vector<2x10xf32>
    %231 = math.tanh %230 : vector<2x10xf32>
    %232 = arith.mulf %227, %231 : vector<2x10xf32>
    %233 = tpu.concatenate %36, %64, %92, %120, %148, %176, %204, %232 in 1 : vector<2x10xf32>, vector<2x10xf32>, vector<2x10xf32>, vector<2x10xf32>, vector<2x10xf32>, vector<2x10xf32>, vector<2x10xf32>, vector<2x10xf32> -> vector<2x80xf32>
    %c0_41 = arith.constant 0 : index
    %c0_42 = arith.constant 0 : index
    %234 = vector.load %arg4[%c0_41, %c0_42] : memref<80x4xf32, #tpu.memory_space<vmem>>, vector<80x4xf32>
    %cst_43 = arith.constant dense<0.000000e+00> : vector<2x4xf32>
    %235 = tpu.matmul %233, %234, %cst_43 {dimension_numbers = #tpu.dot_dimension_numbers<[1], [0], [0], [1], [0, 0, 1, 1], [], []>} : vector<2x80xf32>, vector<80x4xf32>, vector<2x4xf32> -> vector<2x4xf32>
    %c0_44 = arith.constant 0 : index
    %c0_45 = arith.constant 0 : index
    %236 = vector.load %arg5[%c0_44, %c0_45] : memref<1x4xf32, #tpu.memory_space<vmem>>, vector<1x4xf32>
    %237 = vector.broadcast %236 : vector<1x4xf32> to vector<2x4xf32>
    %238 = arith.addf %235, %237 : vector<2x4xf32>
    %c0_46 = arith.constant 0 : index
    %c0_47 = arith.constant 0 : index
    %239 = vector.load %arg6[%c0_46, %c0_47] : memref<2x4xf32, #tpu.memory_space<vmem>>, vector<2x4xf32>
    tpu.vector_store %arg6[%c0_46, %c0_47], %238 {strides = array<i32>} : memref<2x4xf32, #tpu.memory_space<vmem>>, vector<2x4xf32>,
    return
  }
}

</mosaic_0001>

<bundles_post_ra>
// kernel: tpu_custom_call.1
= control target key start
LH: loop header
LB: loop body
LE: loop exit
PB: predicated region body
PF: predicated region fallthrough
CT: control target
= control target key end

     0   :  { %vm45_vm0 = vcmask 1045504   ;;  %vm38_vm1 = vcmask 179200   ;;  %s1636_s0 = inlined_call_operand.vmem [shape: f32[16,22], index: 0, kind: input, shape index: {}]   ;;  %s1637_s1 = inlined_call_operand.vmem [shape: f32[22,40], index: 1, kind: input, shape index: {}]   ;;  %s1638_s2 = inlined_call_operand.vmem [shape: f32[10,40], index: 2, kind: input, shape index: {}]   ;;  %s1639_s3 = inlined_call_operand.vmem [shape: f32[1,40], index: 3, kind: input, shape index: {}]   ;;  %s1640_s4 = inlined_call_operand.vmem [shape: f32[80,4], index: 4, kind: input, shape index: {}]   ;;  %s1641_s5 = inlined_call_operand.vmem [shape: f32[1,4], index: 5, kind: input, shape index: {}]   ;;  %s1642_s6 = inlined_call_operand.hbm [shape: f32[2,4], index: 6, kind: output, shape index: {}]  }
   0x1   :  { %v31_v0 = vld [vmem:[%s1637_s1 + $0x10] sm:$0x3f]  ;;  %v30_v1 = vld [vmem:[%s1637_s1 + $0x8] sm:$0xff]  ;;  %v27_v2 = vld [vmem:[%s1636_s0] sm:$0xff] }
   0x2   :  { %1182 = vmatprep.subr.msk.mxu1 %vm45_vm0, %v31_v0  ;;  %v29_v3 = vld [vmem:[%s1637_s1] sm:$0xff]  ;;  %1188 = vmatprep.mubr.msk.f32.mxu1 %vm38_vm1, %v27_v2 }
   0x3   :  { %1183 = vmatpush3.msk.msra.mxu1 %vm45_vm0, %v31_v0 }
   0x4   :  { %11 = vsyncpa [#allocation3], 0  ;;  %1184 = vmatprep.subr.mxu1 %v30_v1  ;;  %v1427_v4 = vld [vmem:[%s1638_s2 + $0x8] sm:$0x3]  ;;  %vm128_vm2 = vcmask 1041408   ;;  %v1366_v5 = vmov 0.0  }
   0x5   :  { %1219 = vmatprep.subr.mxu0 %v1366_v5  ;;  %1185 = vmatpush3.msra.mxu1 %v30_v1  ;;  %v28_v6 = vld [vmem:[%s1636_s0 + $0x8] sm:$0xff]  ;;  %v1438_v7 = vld [vmem:[%s1638_s2] sm:$0xff]  ;;  %vm1367_vm3 = vmmov 0   ;;  %s1368_s10 = smov 108   ;;  %s1370_s11 = smov 20   ;;  %vm124_vm4 = vcmask 80896  }
   0x6   :  { %1220 = vmatpush3.msk.msra.mxu0 %vm128_vm2, %v1427_v4  ;;  %1186 = vmatprep.subr.mxu1 %v29_v3  ;;  %v1113_v8 = vld [vmem:[%s1639_s3] ss:$0 sm:$0xff]  ;;  %s1369_s3 = smov 10   ;;  %s1371_s12 = smov 98   ;;  %vm994_vm5 = vcmask 162816   ;;  %vm996_vm6 = vcmask 244736  }
   0x7   :  { %1221 = vmatprep.subr.mxu0 %v1366_v5  ;;  %1187 = vmatpush3.msra.mxu1 %v29_v3  ;;  %s1372_s13 = smov 30   ;;  %s1373_s26 = smov 118   ;;  %vm998_vm7 = vcmask 326656   ;;  %vm1000_vm8 = vcmask 408576   ;;  %vm1002_vm9 = vcmask 490496   ;;  %vm1004_vm10 = vcmask 572416  }
   0x8   :  { %1222 = vmatpush3.msra.mxu0 %v1438_v7  ;;  %1189 = vmatmul.mubr.msk.f32.vlgmr.msra.gmra.mxu1 %vm38_vm1, %v28_v6  ;;  %s1374_s0 = smov 40   ;;  %vm1023_vm11 = vcmask 654336   ;;  %vm1097_vm12 = vcmask 25600  }
   0x9   :  { %1191 = vmatprep.subr.mxu1 %v1366_v5  ;;  %1195 = vmatprep.mubr.msk.f32.mxu1 %vm1367_vm3, %v1366_v5 }
   0xa   :  { %1192 = vmatpush3.msk.msra.mxu1 %vm128_vm2, %v1427_v4  ;;  %1223 = vmatprep.mubr.msk.f32.mxu0 %vm1367_vm3, %v1366_v5 }
   0xb   :  { %1193 = vmatprep.subr.mxu1 %v1366_v5  ;;  %1233 = vmatprep.subr.mxu0 %v1366_v5 }
   0xc   :  { %1194 = vmatpush3.msra.mxu1 %v1438_v7 }
   0xd   :  { %1196 = vmatmul.mubr.f32.vlgmr.msra.gmra.mxu1 %v1366_v5  ;;  %1198 = vmatprep.subr.mxu1 %v1366_v5 }
   0xe   :  { %1199 = vmatpush3.msk.msra.mxu1 %vm128_vm2, %v1427_v4  ;;  %1202 = vmatprep.mubr.msk.f32.mxu1 %vm1367_vm3, %v1366_v5 }
   0xf   :  { %1200 = vmatprep.subr.mxu1 %v1366_v5 }
  0x10   :  { %1201 = vmatpush3.msra.mxu1 %v1438_v7 }
  0x11   :  { %1205 = vmatprep.subr.mxu1 %v1366_v5 }
  0xc8   :  { %v1190_v9 = vpop.f32.mrf.mxu1 }
  0xc9   :  { %v1465_v10 = vadd.f32 %v1190_v9, %v1113_v8 }
  0xca   :  { %v115_v11 = vpop.f32.mrf.mxu1 }
  0xcb   :  { %v1467_v12 = vadd.f32 %v1113_v8, %v115_v11 }
  0xcd   :  { %v198_v13 = vpop.f32.mrf.mxu1 }
  0xce   :  { %v202_v14 = vadd.f32 %v198_v13, %v1467_v12 }
  0xcf   :  { %v1197_v15 = vpop.f32.mrf.mxu1 }
  0xd0   :  { %1280 = vtanh.f32 %v202_v14  ;;  %v1118_v17 = vmul.f32 -1.442695, %v202_v14 }
  0xd2   :  { %1282 = vpow2.f32 %v1118_v17 }
  0xdd   :  { %v1281_v16 = vpop.eup %1280 }
  0xde   :  { %212 = vrot.lane.b32.xlu0 %v1281_v16, %s1368_s10 }
  0xdf   :  { %v1283_v18 = vpop.eup %1282 }
  0xe0   :  { %v206_v19 = vadd.f32 1.0, %v1283_v18 }
  0xe2   :  { %1284 = vrcp.f32 %v206_v19 }
  0xef   :  { %v1285_v20 = vpop.eup %1284 }
  0xf0   :  { %v210_v23 = vmul.f32 0.0, %v1285_v20 }
 0x150   :  { %v213_v21 = vpop.permute.xlu0 %212 }
 0x151   :  { %v215_v22 = vmul.f32 %v1285_v20, %v213_v21 }
 0x153   :  { %217 = vrot.lane.b32.xlu0 %v215_v22, %s1369_s3 }
 0x1c5   :  { %v218_v24 = vpop.permute.xlu0 %217 }
 0x1c6   :  { %v220_v25 = vadd.f32 %v218_v24, %v210_v23 }
 0x1c8   :  { %1286 = vtanh.f32 %v220_v25  ;;  %v314_v41 = vrot.slane %v220_v25, 6 }
 0x1d5   :  { %v1287_v26 = vpop.eup %1286 }
 0x1d6   :  { %223 = vrot.lane.b32.xlu1 %v1287_v26, %s1370_s11 }
 0x248   :  { %v224_v27 = vpop.permute.xlu1 %223 }
 0x249   :  { %v226_v28 = vmul.f32 %v1285_v20, %v224_v27 }
 0x24b   :  { %228 = vrot.lane.b32.xlu1 %v226_v28, %s1371_s12 }
 0x2bd   :  { %v1474_v29 = vpop.permute.xlu1 %228 }
 0x2be   :  { %1203 = vmatmul.mubr.msk.f32.vlgmr.msra.gmra.mxu1 %vm124_vm4, %v1474_v29 }
 0x2bf   :  { %1206 = vmatpush3.msk.msra.mxu1 %vm128_vm2, %v1427_v4  ;;  %1209 = vmatprep.mubr.msk.f32.mxu1 %vm1367_vm3, %v1366_v5 }
 0x2c0   :  { %1207 = vmatprep.subr.mxu1 %v1366_v5 }
 0x2c1   :  { %1208 = vmatpush3.msra.mxu1 %v1438_v7 }
 0x2c2   :  { %1212 = vmatprep.subr.mxu1 %v1366_v5 }
 0x37e   :  { %v298_v30 = vpop.f32.mrf.mxu1 }
 0x37f   :  { %v303_v31 = vrot.slane %v298_v30, 6 }
 0x380   :  { %v1204_v32 = vpop.f32.mrf.mxu1 }
 0x381   :  { %v305_v33 = vadd.f32 %v303_v31, %v1467_v12 }
 0x383   :  { %1288 = vtanh.f32 %v305_v33  ;;  %v1121_v35 = vmul.f32 -1.442695, %v305_v33 }
 0x385   :  { %1290 = vpow2.f32 %v1121_v35 }
 0x390   :  { %v1289_v34 = vpop.eup %1288 }
 0x391   :  { %318 = vrot.lane.b32.xlu0 %v1289_v34, %s1368_s10 }
 0x392   :  { %v1291_v36 = vpop.eup %1290 }
 0x393   :  { %v309_v37 = vadd.f32 1.0, %v1291_v36 }
 0x395   :  { %1292 = vrcp.f32 %v309_v37 }
 0x3a2   :  { %v1293_v38 = vpop.eup %1292 }
 0x3a3   :  { %v316_v42 = vmul.f32 %v1293_v38, %v314_v41 }
 0x403   :  { %v319_v39 = vpop.permute.xlu0 %318 }
 0x404   :  { %v321_v40 = vmul.f32 %v1293_v38, %v319_v39 }
 0x406   :  { %323 = vrot.lane.b32.xlu1 %v321_v40, %s1369_s3 }
 0x478   :  { %v324_v43 = vpop.permute.xlu1 %323 }
 0x479   :  { %v326_v44 = vadd.f32 %v324_v43, %v316_v42 }
 0x47b   :  { %1294 = vtanh.f32 %v326_v44  ;;  %v421_v61 = vrot.slane %v326_v44, 6 }
 0x488   :  { %v1295_v45 = vpop.eup %1294 }
 0x489   :  { %329 = vrot.lane.b32.xlu0 %v1295_v45, %s1370_s11 }
 0x4fb   :  { %v330_v46 = vpop.permute.xlu0 %329 }
 0x4fc   :  { %v1489_v47 = vmul.f32 %v1293_v38, %v330_v46 }
 0x4fe   :  { %v334_v48 = vrot.slane %v1489_v47, 2  ;;  %v1013_v47 = vld [vmem:[%s1640_s4 + $0x38] sm:$0xff] }
 0x500   :  { %335 = vrot.lane.b32.xlu1 %v334_v48, %s1371_s12 }
 0x572   :  { %v336_v49 = vpop.permute.xlu1 %335 }
 0x573   :  { %1210 = vmatmul.mubr.msk.f32.vlgmr.msra.gmra.mxu1 %vm124_vm4, %v336_v49 }
 0x574   :  { %1213 = vmatpush3.msk.msra.mxu1 %vm128_vm2, %v1427_v4  ;;  %1216 = vmatprep.mubr.msk.f32.mxu1 %vm1367_vm3, %v1366_v5 }
 0x575   :  { %1214 = vmatprep.subr.mxu1 %v1366_v5 }
 0x576   :  { %1215 = vmatpush3.msra.mxu1 %v1438_v7 }
 0x577   :  { %1226 = vmatprep.subr.mxu1 %v1366_v5 }
 0x633   :  { %v405_v50 = vpop.f32.mrf.mxu1 }
 0x634   :  { %v410_v51 = vrot.slane %v405_v50, 4 }
 0x635   :  { %v1211_v52 = vpop.f32.mrf.mxu1 }
 0x636   :  { %v412_v53 = vadd.f32 %v410_v51, %v1467_v12 }
 0x638   :  { %1296 = vtanh.f32 %v412_v53  ;;  %v1124_v55 = vmul.f32 -1.442695, %v412_v53 }
 0x63a   :  { %1298 = vpow2.f32 %v1124_v55 }
 0x645   :  { %v1297_v54 = vpop.eup %1296 }
 0x646   :  { %425 = vrot.lane.b32.xlu0 %v1297_v54, %s1368_s10 }
 0x647   :  { %v1299_v56 = vpop.eup %1298 }
 0x648   :  { %v416_v57 = vadd.f32 1.0, %v1299_v56 }
 0x64a   :  { %1300 = vrcp.f32 %v416_v57 }
 0x657   :  { %v1301_v58 = vpop.eup %1300 }
 0x658   :  { %v423_v62 = vmul.f32 %v1301_v58, %v421_v61 }
 0x6b8   :  { %v426_v59 = vpop.permute.xlu0 %425 }
 0x6b9   :  { %v428_v60 = vmul.f32 %v1301_v58, %v426_v59 }
 0x6bb   :  { %430 = vrot.lane.b32.xlu1 %v428_v60, %s1369_s3 }
 0x72d   :  { %v431_v63 = vpop.permute.xlu1 %430 }
 0x72e   :  { %v433_v0 = vadd.f32 %v431_v63, %v423_v62 }
 0x730   :  { %1302 = vtanh.f32 %v433_v0  ;;  %v528_v22 = vrot.slane %v433_v0, 6 }
 0x73d   :  { %v1303_v1 = vpop.eup %1302 }
 0x73e   :  { %436 = vrot.lane.b32.xlu0 %v1303_v1, %s1370_s11 }
 0x7b0   :  { %v437_v2 = vpop.permute.xlu0 %436 }
 0x7b1   :  { %v1507_v3 = vmul.f32 %v1301_v58, %v437_v2 }
 0x7b3   :  { %v441_v6 = vrot.slane %v1507_v3, 4  ;;  %v1007_v3 = vld [vmem:[%s1640_s4 + $0x8] sm:$0xff] }
 0x7b5   :  { %442 = vrot.lane.b32.xlu1 %v441_v6, %s1371_s12 }
 0x827   :  { %v443_v8 = vpop.permute.xlu1 %442 }
 0x828   :  { %1217 = vmatmul.mubr.msk.f32.vlgmr.msra.gmra.mxu1 %vm124_vm4, %v443_v8 }
 0x829   :  { %1227 = vmatpush3.msk.msra.mxu1 %vm128_vm2, %v1427_v4  ;;  %1230 = vmatprep.mubr.msk.f32.mxu1 %vm1367_vm3, %v1366_v5 }
 0x82a   :  { %1228 = vmatprep.subr.mxu1 %v1366_v5 }
 0x82b   :  { %1229 = vmatpush3.msra.mxu1 %v1438_v7 }
 0x82c   :  { %1240 = vmatprep.subr.mxu1 %v1366_v5 }
 0x8e8   :  { %v512_v9 = vpop.f32.mrf.mxu1 }
 0x8e9   :  { %v517_v11 = vrot.slane %v512_v9, 2 }
 0x8ea   :  { %v1218_v13 = vpop.f32.mrf.mxu1 }
 0x8eb   :  { %v519_v14 = vadd.f32 %v517_v11, %v1467_v12 }
 0x8ed   :  { %1304 = vtanh.f32 %v519_v14  ;;  %v1127_v16 = vmul.f32 -1.442695, %v519_v14 }
 0x8ef   :  { %1306 = vpow2.f32 %v1127_v16 }
 0x8fa   :  { %v1305_v15 = vpop.eup %1304 }
 0x8fb   :  { %532 = vrot.lane.b32.xlu0 %v1305_v15, %s1368_s10 }
 0x8fc   :  { %v1307_v17 = vpop.eup %1306 }
 0x8fd   :  { %v523_v18 = vadd.f32 1.0, %v1307_v17 }
 0x8ff   :  { %1308 = vrcp.f32 %v523_v18 }
 0x90c   :  { %v1309_v19 = vpop.eup %1308 }
 0x90d   :  { %v530_v23 = vmul.f32 %v1309_v19, %v528_v22 }
 0x96d   :  { %v533_v20 = vpop.permute.xlu0 %532 }
 0x96e   :  { %v535_v21 = vmul.f32 %v1309_v19, %v533_v20 }
 0x970   :  { %537 = vrot.lane.b32.xlu1 %v535_v21, %s1369_s3 }
 0x9e2   :  { %v538_v24 = vpop.permute.xlu1 %537 }
 0x9e3   :  { %v540_v25 = vadd.f32 %v538_v24, %v530_v23 }
 0x9e5   :  { %1310 = vtanh.f32 %v540_v25  ;;  %v632_v41 = vrot.slane %v540_v25, 6 }
 0x9f2   :  { %v1311_v12 = vpop.eup %1310 }
 0x9f3   :  { %543 = vrot.lane.b32.xlu0 %v1311_v12, %s1370_s11 }
 0xa65   :  { %v544_v26 = vpop.permute.xlu0 %543 }
 0xa66   :  { %v1525_v27 = vmul.f32 %v1309_v19, %v544_v26 }
 0xa68   :  { %v548_v28 = vrot.slane %v1525_v27, 6 }
 0xa6a   :  { %549 = vrot.lane.b32.xlu1 %v548_v28, %s1371_s12 }
 0xadc   :  { %v550_v30 = vpop.permute.xlu1 %549 }
 0xadd   :  { %1224 = vmatmul.mubr.msk.f32.vlgmr.msra.gmra.mxu0 %vm124_vm4, %v550_v30 }
 0xade   :  { %1234 = vmatpush3.msk.msra.mxu0 %vm128_vm2, %v1427_v4  ;;  %1237 = vmatprep.mubr.msk.f32.mxu0 %vm1367_vm3, %v1366_v5 }
 0xadf   :  { %1235 = vmatprep.subr.mxu0 %v1366_v5 }
 0xae0   :  { %1236 = vmatpush3.msra.mxu0 %v1438_v7 }
 0xae1   :  { %1247 = vmatprep.subr.mxu0 %v1366_v5 }
 0xb9d   :  { %v619_v31 = vpop.f32.mrf.mxu0 }
 0xb9e   :  { %v623_v32 = vadd.f32 %v619_v31, %v1465_v10 }
 0xb9f   :  { %v1225_v33 = vpop.f32.mrf.mxu0 }
 0xba0   :  { %1312 = vtanh.f32 %v623_v32  ;;  %v1130_v35 = vmul.f32 -1.442695, %v623_v32 }
 0xba2   :  { %1314 = vpow2.f32 %v1130_v35 }
 0xbad   :  { %v1313_v34 = vpop.eup %1312 }
 0xbae   :  { %636 = vrot.lane.b32.xlu0 %v1313_v34, %s1368_s10 }
 0xbaf   :  { %v1315_v36 = vpop.eup %1314 }
 0xbb0   :  { %v627_v37 = vadd.f32 1.0, %v1315_v36 }
 0xbb2   :  { %1316 = vrcp.f32 %v627_v37 }
 0xbbf   :  { %v1317_v38 = vpop.eup %1316 }
 0xbc0   :  { %v634_v42 = vmul.f32 %v1317_v38, %v632_v41 }
 0xc20   :  { %v637_v39 = vpop.permute.xlu0 %636 }
 0xc21   :  { %v639_v40 = vmul.f32 %v1317_v38, %v637_v39 }
 0xc23   :  { %641 = vrot.lane.b32.xlu1 %v639_v40, %s1369_s3 }
 0xc95   :  { %v642_v43 = vpop.permute.xlu1 %641 }
 0xc96   :  { %v644_v44 = vadd.f32 %v642_v43, %v634_v42 }
 0xc98   :  { %1318 = vtanh.f32 %v644_v44 }
 0xca5   :  { %v1319_v45 = vpop.eup %1318 }
 0xca6   :  { %647 = vrot.lane.b32.xlu0 %v1319_v45, %s1370_s11 }
 0xd18   :  { %v648_v46 = vpop.permute.xlu0 %647 }
 0xd19   :  { %v1543_v49 = vmul.f32 %v1317_v38, %v648_v46 }
 0xd1b   :  { %652 = vrot.lane.b32.xlu1 %v1543_v49, %s1371_s12 }
 0xd8d   :  { %v653_v50 = vpop.permute.xlu1 %652 }
 0xd8e   :  { %1231 = vmatmul.mubr.msk.f32.vlgmr.msra.gmra.mxu1 %vm124_vm4, %v653_v50 }
 0xd8f   :  { %1241 = vmatpush3.msk.msra.mxu1 %vm128_vm2, %v1427_v4  ;;  %1244 = vmatprep.mubr.msk.f32.mxu1 %vm1367_vm3, %v1366_v5 }
 0xd90   :  { %1242 = vmatprep.subr.mxu1 %v1366_v5 }
 0xd91   :  { %1243 = vmatpush3.msra.mxu1 %v1438_v7  ;;  %v738_v7 = vrot.slane %v644_v44, 6 }
 0xe4e   :  { %v722_v51 = vpop.f32.mrf.mxu1 }
 0xe4f   :  { %v727_v52 = vrot.slane %v722_v51, 6  ;;  %v1015_v51 = vld [vmem:[%s1640_s4 + $0x48] sm:$0xff] }
 0xe50   :  { %v1232_v53 = vpop.f32.mrf.mxu1 }
 0xe51   :  { %v729_v54 = vadd.f32 %v727_v52, %v1465_v10  ;;  %v1014_v52 = vld [vmem:[%s1640_s4 + $0x40] sm:$0xff]  ;;  %v1011_v53 = vld [vmem:[%s1640_s4 + $0x28] sm:$0xff] }
 0xe53   :  { %1320 = vtanh.f32 %v729_v54  ;;  %v1133_v56 = vmul.f32 -1.442695, %v729_v54  ;;  %v1010_v54 = vld [vmem:[%s1640_s4 + $0x20] sm:$0xff] }
 0xe55   :  { %1322 = vpow2.f32 %v1133_v56  ;;  %v1008_v56 = vld [vmem:[%s1640_s4 + $0x10] sm:$0xff] }
 0xe60   :  { %v1321_v55 = vpop.eup %1320 }
 0xe61   :  { %742 = vrot.lane.b32.xlu0 %v1321_v55, %s1368_s10  ;;  %v1009_v55 = vld [vmem:[%s1640_s4 + $0x18] sm:$0xff] }
 0xe62   :  { %v1323_v57 = vpop.eup %1322 }
 0xe63   :  { %v733_v4 = vadd.f32 1.0, %v1323_v57 }
 0xe65   :  { %1324 = vrcp.f32 %v733_v4 }
 0xe72   :  { %v1325_v58 = vpop.eup %1324 }
 0xe73   :  { %v740_v61 = vmul.f32 %v1325_v58, %v738_v7 }
 0xed3   :  { %v743_v59 = vpop.permute.xlu0 %742 }
 0xed4   :  { %v745_v60 = vmul.f32 %v1325_v58, %v743_v59 }
 0xed6   :  { %747 = vrot.lane.b32.xlu1 %v745_v60, %s1369_s3 }
 0xf48   :  { %v748_v62 = vpop.permute.xlu1 %747 }
 0xf49   :  { %v750_v63 = vadd.f32 %v748_v62, %v740_v61 }
 0xf4b   :  { %1326 = vtanh.f32 %v750_v63  ;;  %v845_v23 = vrot.slane %v750_v63, 6 }
 0xf58   :  { %v1327_v0 = vpop.eup %1326 }
 0xf59   :  { %753 = vrot.lane.b32.xlu0 %v1327_v0, %s1370_s11 }
 0xfcb   :  { %v754_v1 = vpop.permute.xlu0 %753 }
 0xfcc   :  { %v1558_v2 = vmul.f32 %v1325_v58, %v754_v1 }
 0xfce   :  { %v758_v8 = vrot.slane %v1558_v2, 2 }
 0xfd0   :  { %759 = vrot.lane.b32.xlu1 %v758_v8, %s1371_s12 }
0x1042   :  { %v760_v9 = vpop.permute.xlu1 %759 }
0x1043   :  { %1238 = vmatmul.mubr.msk.f32.vlgmr.msra.gmra.mxu0 %vm124_vm4, %v760_v9 }
0x1044   :  { %1267 = vmatprep.mubr.msk.f32.mxu0 %vm1367_vm3, %v1366_v5  ;;  %1248 = vmatpush3.msra.mxu0 %v1015_v51 }
0x1045   :  { %1249 = vmatprep.subr.mxu0 %v1366_v5 }
0x1046   :  { %1250 = vmatpush3.msra.mxu0 %v1014_v52 }
0x1047   :  { %1251 = vmatprep.subr.mxu0 %v1366_v5 }
0x1048   :  { %1252 = vmatpush3.msra.mxu0 %v1013_v47 }
0x1049   :  { %1253 = vmatprep.subr.mxu0 %v1366_v5 }
0x1103   :  { %v829_v11 = vpop.f32.mrf.mxu0 }
0x1104   :  { %v834_v13 = vrot.slane %v829_v11, 4 }
0x1105   :  { %v1239_v14 = vpop.f32.mrf.mxu0 }
0x1106   :  { %v836_v15 = vadd.f32 %v834_v13, %v1465_v10 }
0x1108   :  { %1328 = vtanh.f32 %v836_v15  ;;  %v1136_v17 = vmul.f32 -1.442695, %v836_v15 }
0x110a   :  { %1330 = vpow2.f32 %v1136_v17 }
0x1115   :  { %v1329_v16 = vpop.eup %1328 }
0x1116   :  { %849 = vrot.lane.b32.xlu0 %v1329_v16, %s1368_s10 }
0x1117   :  { %v1331_v18 = vpop.eup %1330 }
0x1118   :  { %v840_v19 = vadd.f32 1.0, %v1331_v18 }
0x111a   :  { %1332 = vrcp.f32 %v840_v19 }
0x1127   :  { %v1333_v20 = vpop.eup %1332 }
0x1128   :  { %v847_v24 = vmul.f32 %v1333_v20, %v845_v23 }
0x1188   :  { %v850_v21 = vpop.permute.xlu0 %849 }
0x1189   :  { %v852_v22 = vmul.f32 %v1333_v20, %v850_v21 }
0x118b   :  { %854 = vrot.lane.b32.xlu1 %v852_v22, %s1369_s3 }
0x11fd   :  { %v855_v25 = vpop.permute.xlu1 %854 }
0x11fe   :  { %v857_v12 = vadd.f32 %v855_v25, %v847_v24 }
0x1200   :  { %1334 = vtanh.f32 %v857_v12 }
0x120d   :  { %v1335_v26 = vpop.eup %1334 }
0x120e   :  { %860 = vrot.lane.b32.xlu0 %v1335_v26, %s1370_s11 }
0x1280   :  { %v861_v30 = vpop.permute.xlu0 %860 }
0x1281   :  { %v863_v31 = vmul.f32 %v1333_v20, %v861_v30 }
0x1283   :  { %v865_v32 = vrot.slane %v863_v31, 4 }
0x1285   :  { %866 = vrot.lane.b32.xlu1 %v865_v32, %s1371_s12 }
0x12f7   :  { %v867_v33 = vpop.permute.xlu1 %866 }
0x12f8   :  { %1245 = vmatmul.mubr.msk.f32.vlgmr.msra.gmra.mxu1 %vm124_vm4, %v867_v33 }
0x13b8   :  { %v936_v34 = vpop.f32.mrf.mxu1 }
0x13b9   :  { %v941_v35 = vrot.slane %v936_v34, 2 }
0x13ba   :  { %v1246_v36 = vpop.f32.mrf.mxu1 }
0x13bb   :  { %v943_v37 = vadd.f32 %v941_v35, %v1465_v10  ;;  %v952_v10 = vrot.slane %v857_v12, 6 }
0x13bd   :  { %1336 = vtanh.f32 %v943_v37  ;;  %v1139_v39 = vmul.f32 -1.442695, %v943_v37 }
0x13bf   :  { %1338 = vpow2.f32 %v1139_v39 }
0x13ca   :  { %v1337_v38 = vpop.eup %1336 }
0x13cb   :  { %956 = vrot.lane.b32.xlu0 %v1337_v38, %s1368_s10 }
0x13cc   :  { %v1339_v40 = vpop.eup %1338 }
0x13cd   :  { %v947_v41 = vadd.f32 1.0, %v1339_v40 }
0x13cf   :  { %1340 = vrcp.f32 %v947_v41 }
0x13dc   :  { %v1341_v42 = vpop.eup %1340 }
0x13dd   :  { %v954_v45 = vmul.f32 %v1341_v42, %v952_v10 }
0x143d   :  { %v957_v43 = vpop.permute.xlu0 %956 }
0x143e   :  { %v959_v44 = vmul.f32 %v1341_v42, %v957_v43 }
0x1440   :  { %961 = vrot.lane.b32.xlu1 %v959_v44, %s1369_s3 }
0x1444   :  { %972 = vrot.lane.b32.xlu1 %v334_v48, %s1368_s10  ;;  %s1375_s10 = smov [#allocation2]  }
0x1448   :  { %979 = vrot.lane.b32.xlu1 %v1543_v49, %s1369_s3  ;;  %v1012_v49 = vld [vmem:[%s1640_s4 + $0x30] sm:$0xff]  ;;  %s1105_s3 = sshll.u32 %s1375_s10, 4  ;;  %s1106_s3 = int_to_ptr.vmem [resolvable:$true] %s1105_s3 }
0x1449   :  { %1254 = vmatpush3.msra.mxu0 %v1012_v49  ;;  %p1349_p1 = scmp.lt.s32.totalorder %s1106_s3, %s1106_s3 }
0x144a   :  { %1255 = vmatprep.subr.mxu0 %v1366_v5 }
0x144b   :  { %1256 = vmatpush3.msra.mxu0 %v1011_v53 }
0x144c   :  { %985 = vrot.lane.b32.xlu1 %v865_v32, %s1372_s13  ;;  %1257 = vmatprep.subr.mxu0 %v1366_v5 }
0x144d   :  { %1258 = vmatpush3.msra.mxu0 %v1010_v54 }
0x144e   :  { %1259 = vmatprep.subr.mxu0 %v1366_v5 }
0x144f   :  { %1260 = vmatpush3.msra.mxu0 %v1009_v55 }
0x1450   :  { %1261 = vmatprep.subr.mxu0 %v1366_v5 }
0x1451   :  { %1262 = vmatpush3.msra.mxu0 %v1008_v56 }
0x1452   :  { %1263 = vmatprep.subr.mxu0 %v1366_v5 }
0x1453   :  { %1264 = vmatpush3.msra.mxu0 %v1007_v3 }
0x1454   :  { %1265 = vmatprep.subr.mxu0 %v1366_v5 }
0x14b2   :  { %v962_v46 = vpop.permute.xlu1 %961 }
0x14b3   :  { %v964_v50 = vadd.f32 %v962_v46, %v954_v45 }
0x14b5   :  { %1342 = vtanh.f32 %v964_v50 }
0x14b6   :  { %v973_v59 = vpop.permute.xlu1 %972 }
0x14b7   :  { %v993_v7 = vsel %vm124_vm4, %v1474_v29, %v973_v59  ;;  %v1140_v29 = vld [vmem:[%s1641_s5] ss:$0 sm:$0xff] }
0x14ba   :  { %v980_v62 = vpop.permute.xlu1 %979 }
0x14be   :  { %v986_v2 = vpop.permute.xlu1 %985 }
0x14c2   :  { %v1343_v48 = vpop.eup %1342 }
0x14c3   :  { %967 = vrot.lane.b32.xlu0 %v1343_v48, %s1370_s11 }
0x14c7   :  { %975 = vrot.lane.b32.xlu0 %v441_v6, %s1373_s26  ;;  %v1006_v6 = vld [vmem:[%s1640_s4] sm:$0xff] }
0x14c8   :  { %1266 = vmatpush3.msra.mxu0 %v1006_v6 }
0x14cb   :  { %982 = vrot.lane.b32.xlu0 %v758_v8, %s1370_s11  ;;  %s1344_s11 = scalar_lea.vmem %s1106_s3, 32 }
0x14cc   :  { %p1345_p0 = scmp.ne.s32.totalorder %s1106_s3, %s1344_s11  ;;  %p1350_p2 = scmp.lt.s32.totalorder %s1344_s11, %s1344_s11 }
0x14ce   :  { %p1351_p3 = por %p1350_p2, %p1349_p1 }
0x14d0   :  { %p1352_p4 = pnand %p1351_p3, %p1345_p0 }
0x1535   :  { %v968_v57 = vpop.permute.xlu0 %967 }
0x1536   :  { %v970_v4 = vmul.f32 %v1341_v42, %v968_v57 }
0x1538   :  { %v989_v58 = vrot.slane %v970_v4, 6 }
0x1539   :  { %v976_v60 = vpop.permute.xlu0 %975 }
0x153a   :  { %990 = vrot.lane.b32.xlu0 %v989_v58, %s1374_s0  ;;  %v995_v61 = vsel %vm994_vm5, %v993_v7, %v976_v60 }
0x153b   :  { %v997_v5 = vsel %vm996_vm6, %v995_v61, %v548_v28 }
0x153c   :  { %v999_v63 = vsel %vm998_vm7, %v997_v5, %v980_v62 }
0x153d   :  { %v983_v0 = vpop.permute.xlu0 %982 }
0x153e   :  { %v1001_v1 = vsel %vm1000_vm8, %v999_v63, %v983_v0 }
0x153f   :  { %v1003_v8 = vsel %vm1002_vm9, %v1001_v1, %v986_v2 }
0x15ac   :  { %v991_v9 = vpop.permute.xlu0 %990 }
0x15ad   :  { %v1005_v11 = vsel %vm1004_vm10, %v1003_v8, %v991_v9 }
0x15ae   :  { %1268 = vmatmul.mubr.msk.f32.vlgmr.msra.gmra.mxu0 %vm1023_vm11, %v1005_v11 }
0x166e   :  { %v1093_v27 = vpop.f32.mrf.mxu0 }
0x166f   :  { %v1094_v28 = vadd.f32 %v1140_v29, %v1093_v27 }
0x1670   :  { %v1269_v13 = vpop.f32.mrf.mxu0 }
0x1671   :  { %1098 = vst.msk [vmem:[#allocation2] sm:$0x3] %vm1097_vm12, %v1094_v28 }
0x1672   :  { %1355 = shalt.err (!%p1352_p4)
}
0x1673   :  { %1108 = dma.vmem_to_hbm [thread:$0]  %s1106_s3, 32, %s1642_s6, [#allocation3]  }
0x1674   :  { %1364 = dma.done.wait [#allocation3], 32  }
0x1675   :  { %1365 = vsyncadd [#allocation3], 4294967264 }
0x1676   :  { %1112 = vsyncpa [#allocation3], 1 }

</bundles_post_ra>
